<compile_context>
chip_gen: v6e
topology: v6e:2x2x1
jax: 0.10.0
libtpu: 0.0.40
codegen_flags: <defaults>
</compile_context>

<pallas_src>
import functools

import jax
import jax.numpy as jnp
import numpy as np
from jax.experimental import pallas as pl
from jax.experimental.pallas import tpu as pltpu


# --------------------------------------------------------------------------- #
# Kernels
# --------------------------------------------------------------------------- #
def _emb_rmsnorm_onehot_kernel(ids_ref, tab_ref, pos_ref, scale_ref, out_ref,
                               *, eps, vocab):
    """Small-vocab path: the row gather is a one-hot matmul on the MXU."""
    # ids_ref  : (1, 1, TQ, 1) int32  VMEM  token ids of this block (column vector)
    # tab_ref  : (vocab, E)           VMEM-resident token-embedding table
    # pos_ref  : (TQ, E)              contiguous position-embedding slab
    # scale_ref: (1, E)               RMSNorm scale
    # out_ref  : (1, TQ, E)
    tq = out_ref.shape[1]
    ids_col = ids_ref[0, 0]                                        # (TQ, 1) int32
    onehot = (jax.lax.broadcasted_iota(jnp.int32, (tq, vocab), 1)
              == ids_col).astype(tab_ref.dtype)                    # (TQ, vocab)
    # Gather == one-hot matmul; accumulate in f32 on the MXU.
    x = jnp.dot(onehot, tab_ref[...],
                preferred_element_type=jnp.float32)                # (TQ, E) f32
    x = x + pos_ref[...].astype(jnp.float32)
    inv_rms = jax.lax.rsqrt(jnp.mean(x * x, axis=-1, keepdims=True) + eps)
    out = scale_ref[...].astype(jnp.float32) * (x * inv_rms)
    out_ref[0] = out.astype(out_ref.dtype)


def _emb_rmsnorm_gather_kernel(ids_ref, tab_ref, pos_ref, scale_ref, out_ref,
                               gat_ref, *, eps, T, TQ):
    """Large-vocab fallback: grouped 8-row on-chip gather from the resident table."""
    # ids_ref  : SMEM (B*T,) int32 (scalar-prefetch)
    # gat_ref  : (TQ, E) VMEM scratch in the table's *native* dtype
    j = pl.program_id(0)
    b = pl.program_id(1)
    base = b * T + j * TQ

    ngrp = TQ // 8

    def grp(g, carry):
        off = pl.multiple_of(g * 8, 8)
        for r in range(8):                      # fully unrolled 8-row inner body
            row = off + r
            gat_ref[row, :] = tab_ref[ids_ref[base + row], :]
        return carry

    if ngrp > 0:
        jax.lax.fori_loop(0, ngrp, grp, 0)
    for row in range(ngrp * 8, TQ):             # static tail if TQ % 8 != 0
        gat_ref[row, :] = tab_ref[ids_ref[base + row], :]

    # One bulk cast to f32 after the gather (no per-row casts).
    x = gat_ref[...].astype(jnp.float32) + pos_ref[...].astype(jnp.float32)
    inv_rms = jax.lax.rsqrt(jnp.mean(x * x, axis=-1, keepdims=True) + eps)
    out = scale_ref[...].astype(jnp.float32) * (x * inv_rms)
    out_ref[0] = out.astype(out_ref.dtype)


# --------------------------------------------------------------------------- #
# Wrapper
# --------------------------------------------------------------------------- #
def _pick_tq(T, target=256):
    """Largest tq <= target dividing T that is a multiple of 8 (or tq == T)."""
    for tq in range(min(target, T), 0, -1):
        if T % tq == 0 and (tq % 8 == 0 or tq == T):
            return tq
    return T


def _vmem_capacity_bytes():
    try:
        cap = int(pltpu.get_tpu_info().vmem_capacity_bytes)
        if cap > 0:
            return cap
    except Exception:
        pass
    return 64 << 20          # conservative default: v7x per-TensorCore VMEM


def embeddings_forward(tokens, token_emb, pos_emb, scale, *, eps=1e-8, tq=None,
                       out_dtype=jnp.float32, onehot_max_vocab=4096):
    """tokens: (B, T) int32.  Returns (B, T, E) in `out_dtype` (f32 matches the module)."""
    B, T = tokens.shape
    vocab, E = token_emb.shape
    max_len = pos_emb.shape[0]
    assert T <= max_len, f"sequence length {T} exceeds max_len {max_len}"

    TQ = _pick_tq(T) if tq is None else tq
    assert T % TQ == 0 and (TQ % 8 == 0 or TQ == T)
    nj = T // TQ

    # Guard token ids into [0, vocab) (PyTorch reference would be UB / error on OOB).
    ids = jnp.clip(tokens.astype(jnp.int32), 0, vocab - 1)
    pos = pos_emb[:T]                       # contiguous slab source, rows 0..T-1
    scale2d = scale.reshape(1, E)

    use_onehot = vocab <= onehot_max_vocab

    # ---- VMEM budget (generation aware; resident table counted once) ----
    cap = _vmem_capacity_bytes()
    it_tab = jnp.dtype(token_emb.dtype).itemsize
    tab_b = vocab * E * it_tab
    pos_b = TQ * E * jnp.dtype(pos_emb.dtype).itemsize
    out_b = TQ * E * jnp.dtype(out_dtype).itemsize
    ids_b = TQ * 4 if use_onehot else B * T * 4
    work_b = vocab * TQ * it_tab if use_onehot else TQ * E * it_tab
    needed = tab_b + 2 * (pos_b + out_b + ids_b) + work_b + 4 * E * 4
    headroom = 8 << 20                      # compiler-internal scratch, misc
    if needed + headroom > cap:
        raise NotImplementedError(
            "token-embedding table too large for the VMEM-resident path "
            f"(need ~{needed >> 20} MiB of {cap >> 20} MiB VMEM). "
            "TODO(synk): double-buffered manual-DMA row gather for huge vocabs.")
    vmem_limit = int(min(cap - (2 << 20), max(needed + headroom, 32 << 20)))

    compiler_params = pltpu.CompilerParams(
        dimension_semantics=("parallel", "parallel"),   # no accumulator on either axis
        vmem_limit_bytes=vmem_limit)

    out_shape = jax.ShapeDtypeStruct((B, T, E), out_dtype)

    def build(single_buffer_consts):
        # Constant-index blocks never need a second pipeline buffer.
        const_kw = ({"pipeline_mode": pl.Buffered(1)} if single_buffer_consts else {})
        if use_onehot:
            kernel = functools.partial(_emb_rmsnorm_onehot_kernel, eps=eps, vocab=vocab)
            ids4 = ids.reshape(B, nj, TQ, 1)            # (TQ, 1) column per block
            grid_spec = pltpu.PrefetchScalarGridSpec(
                num_scalar_prefetch=0,
                grid=(nj, B),                           # batch innermost -> pos slab reused
                in_specs=[
                    pl.BlockSpec((1, 1, TQ, 1), lambda j, b: (b, j, 0, 0)),
                    pl.BlockSpec((vocab, E), lambda j, b: (0, 0), **const_kw),
                    pl.BlockSpec((TQ, E), lambda j, b: (j, 0)),
                    pl.BlockSpec((1, E), lambda j, b: (0, 0), **const_kw),
                ],
                out_specs=pl.BlockSpec((1, TQ, E), lambda j, b: (b, j, 0)),
            )
            args = (ids4, token_emb, pos, scale2d)
        else:
            # Fallback for large vocabularies: grouped on-chip gather.
            # TODO(synk): very large B*T can exhaust SMEM via the prefetched id vector;
            #             switch to per-block SMEM tiles if that becomes a limit.
            kernel = functools.partial(_emb_rmsnorm_gather_kernel, eps=eps, T=T, TQ=TQ)
            ids_flat = ids.reshape(B * T)
            grid_spec = pltpu.PrefetchScalarGridSpec(
                num_scalar_prefetch=1,                  # ids land in SMEM
                grid=(nj, B),
                in_specs=[
                    pl.BlockSpec((vocab, E), lambda j, b, ids_s: (0, 0), **const_kw),
                    pl.BlockSpec((TQ, E), lambda j, b, ids_s: (j, 0)),
                    pl.BlockSpec((1, E), lambda j, b, ids_s: (0, 0), **const_kw),
                ],
                out_specs=pl.BlockSpec((1, TQ, E), lambda j, b, ids_s: (b, j, 0)),
                scratch_shapes=[pltpu.VMEM((TQ, E), token_emb.dtype)],
            )
            args = (ids_flat, token_emb, pos, scale2d)
        call = pl.pallas_call(kernel, out_shape=out_shape, grid_spec=grid_spec,
                              compiler_params=compiler_params)
        return call, args

    try:
        call, args = build(True)
        out = call(*args)
        return jax.block_until_ready(out)
    except Exception:
        # Installed jax rejected Buffered(1) single-buffering -> default double buffering.
        call, args = build(False)
        return call(*args)


# --------------------------------------------------------------------------- #
# Reference + self-test
# --------------------------------------------------------------------------- #
def _reference(tokens, token_emb, pos_emb, scale, eps=1e-8):
    B, T = tokens.shape
    positions = jnp.broadcast_to(jnp.arange(T), (B, T))
    x = token_emb[tokens].astype(jnp.float32) + pos_emb[positions].astype(jnp.float32)
    rms = jnp.sqrt(jnp.mean(x * x, axis=-1, keepdims=True) + eps)
    return scale.astype(jnp.float32) * (x / rms)


if __name__ == "__main__":
    key = jax.random.PRNGKey(0)

    def run_case(case_key, B, T, vocab, e_dim, max_len, tq=None,
                 emb_dtype=jnp.float32, rtol=1e-5, atol=1e-5):
        k_tok, k_temb, k_pemb, k_s = jax.random.split(case_key, 4)
        tokens = jax.random.randint(k_tok, (B, T), 0, vocab, dtype=jnp.int32)
        token_emb = jax.random.normal(k_temb, (vocab, e_dim), dtype=jnp.float32).astype(emb_dtype)
        pos_emb = jax.random.normal(k_pemb, (max_len, e_dim), dtype=jnp.float32).astype(emb_dtype)
        scale = 1.0 + 0.1 * jax.random.normal(k_s, (e_dim,), dtype=jnp.float32)

        out = embeddings_forward(tokens, token_emb, pos_emb, scale, tq=tq)
        out = jax.block_until_ready(out)
        ref = _reference(tokens, token_emb, pos_emb, scale)
        np.testing.assert_allclose(np.asarray(out), np.asarray(ref), rtol=rtol, atol=atol)

    k1, k2 = jax.random.split(key)
    # (1) Module-default f32 tables: B=2, T=8, E=32 (single token-block per batch elem).
    #     Tolerance is loose because the MXU may evaluate the f32 one-hot matmul in
    #     bf16 passes; a functional bug (wrong row gathered / wrong norm) would be O(1).
    run_case(k1, B=2, T=8, vocab=64, e_dim=32, max_len=16, rtol=2e-2, atol=2e-2)
    # (2) bf16-stored tables (recommended HBM format), multi-block grid (4 x 2 steps),
    #     lane-dense E=128; the one-hot gather is numerically exact here.
    run_case(k2, B=2, T=32, vocab=64, e_dim=128, max_len=64, tq=8,
             emb_dtype=jnp.bfloat16, rtol=1e-4, atol=1e-4)

    print("KERNEL_OK")
</pallas_src>

<mosaic_0001>
module attributes {stable_mosaic.version = 11 : i64} {
  func.func @_emb_rmsnorm_onehot_kernel(%arg0: i32, %arg1: i32, %arg2: memref<1x1x8x1xi32, #tpu.memory_space<vmem>>, %arg3: memref<64x32xf32, #tpu.memory_space<vmem>>, %arg4: memref<8x32xf32, #tpu.memory_space<vmem>>, %arg5: memref<1x32xf32, #tpu.memory_space<vmem>>, %arg6: memref<1x8x32xf32, #tpu.memory_space<vmem>>) attributes {dimension_semantics = [#tpu.dimension_semantics<parallel>, #tpu.dimension_semantics<parallel>], iteration_bounds = array<i64: 1, 2>, scalar_prefetch = 0 : i64, scratch_operands = 0 : i64, tpu.core_type = #tpu.core_type<tc>, window_params = [{transform_indices = @transform_0, window_bounds = array<i64: 1, 1, 8, 1>}, {pipeline_mode = #tpu.pipeline_mode<synchronous>, transform_indices = @transform_1, window_bounds = array<i64: 64, 32>}, {transform_indices = @transform_2, window_bounds = array<i64: 8, 32>}, {pipeline_mode = #tpu.pipeline_mode<synchronous>, transform_indices = @transform_3, window_bounds = array<i64: 1, 32>}, {transform_indices = @transform_4, window_bounds = array<i64: 1, 8, 32>}]} {
    %c0 = arith.constant 0 : index
    %c0_0 = arith.constant 0 : index
    %c0_1 = arith.constant 0 : index
    %c0_2 = arith.constant 0 : index
    %0 = vector.load %arg2[%c0, %c0_0, %c0_1, %c0_2] : memref<1x1x8x1xi32, #tpu.memory_space<vmem>>, vector<1x1x8x1xi32>
    %1 = vector.shape_cast %0 : vector<1x1x8x1xi32> to vector<8x1xi32>
    %2 = tpu.iota {dimensions = array<i32: 1>} : vector<8x64xi32>
    %3 = vector.broadcast %1 : vector<8x1xi32> to vector<8x64xi32>
    %4 = arith.cmpi eq, %2, %3 : vector<8x64xi32>
    %5 = arith.extui %4 : vector<8x64xi1> to vector<8x64xi32>
    %6 = arith.sitofp %5 : vector<8x64xi32> to vector<8x64xf32>
    %c0_3 = arith.constant 0 : index
    %c0_4 = arith.constant 0 : index
    %7 = vector.load %arg3[%c0_3, %c0_4] : memref<64x32xf32, #tpu.memory_space<vmem>>, vector<64x32xf32>
    %cst = arith.constant dense<0.000000e+00> : vector<8x32xf32>
    %8 = tpu.matmul %6, %7, %cst {dimension_numbers = #tpu.dot_dimension_numbers<[1], [0], [0], [1], [0, 0, 1, 1], [], []>} : vector<8x64xf32>, vector<64x32xf32>, vector<8x32xf32> -> vector<8x32xf32>
    %c0_5 = arith.constant 0 : index
    %c0_6 = arith.constant 0 : index
    %9 = vector.load %arg4[%c0_5, %c0_6] : memref<8x32xf32, #tpu.memory_space<vmem>>, vector<8x32xf32>
    %10 = arith.addf %8, %9 : vector<8x32xf32>
    %11 = arith.mulf %10, %10 : vector<8x32xf32>
    %cst_7 = arith.constant dense<0.000000e+00> : vector<8xf32>
    %12 = vector.multi_reduction <add>, %11, %cst_7 [1] : vector<8x32xf32> to vector<8xf32>
    %13 = vector.shape_cast %12 : vector<8xf32> to vector<8x1xf32>
    %cst_8 = arith.constant 3.200000e+01 : f32
    %14 = vector.broadcast %cst_8 : f32 to vector<8x1xf32>
    %15 = arith.divf %13, %14 : vector<8x1xf32>
    %cst_9 = arith.constant 9.99999993E-9 : f32
    %16 = vector.broadcast %cst_9 : f32 to vector<8x1xf32>
    %17 = arith.addf %15, %16 : vector<8x1xf32>
    %18 = math.rsqrt %17 : vector<8x1xf32>
    %c0_10 = arith.constant 0 : index
    %c0_11 = arith.constant 0 : index
    %19 = vector.load %arg5[%c0_10, %c0_11] : memref<1x32xf32, #tpu.memory_space<vmem>>, vector<1x32xf32>
    %20 = vector.broadcast %18 : vector<8x1xf32> to vector<8x32xf32>
    %21 = arith.mulf %10, %20 : vector<8x32xf32>
    %22 = vector.broadcast %19 : vector<1x32xf32> to vector<8x32xf32>
    %23 = arith.mulf %22, %21 : vector<8x32xf32>
    %c0_12 = arith.constant 0 : index
    %c0_13 = arith.constant 0 : index
    %c0_14 = arith.constant 0 : index
    %24 = vector.load %arg6[%c0_12, %c0_13, %c0_14] : memref<1x8x32xf32, #tpu.memory_space<vmem>>, vector<1x8x32xf32>
    %25 = vector.shape_cast %24 : vector<1x8x32xf32> to vector<8x32xf32>
    %26 = vector.shape_cast %23 : vector<8x32xf32> to vector<1x8x32xf32>
    tpu.vector_store %arg6[%c0_12, %c0_13, %c0_14], %26 {strides = array<i32>} : memref<1x8x32xf32, #tpu.memory_space<vmem>>, vector<1x8x32xf32>,
    return
  }
  func.func @transform_0(%arg0: i32, %arg1: i32) -> (i32, i32, i32, i32) {
    %c0_i32 = arith.constant 0 : i32
    %c0_i32_0 = arith.constant 0 : i32
    %c0_i32_1 = arith.constant 0 : i32
    return %arg1, %arg0, %c0_i32, %c0_i32_0 : i32, i32, i32, i32
  }
  func.func @transform_1(%arg0: i32, %arg1: i32) -> (i32, i32) {
    %c0_i32 = arith.constant 0 : i32
    %c0_i32_0 = arith.constant 0 : i32
    %c0_i32_1 = arith.constant 0 : i32
    return %c0_i32, %c0_i32_0 : i32, i32
  }
  func.func @transform_2(%arg0: i32, %arg1: i32) -> (i32, i32) {
    %c0_i32 = arith.constant 0 : i32
    %c0_i32_0 = arith.constant 0 : i32
    return %arg0, %c0_i32 : i32, i32
  }
  func.func @transform_3(%arg0: i32, %arg1: i32) -> (i32, i32) {
    %c0_i32 = arith.constant 0 : i32
    %c0_i32_0 = arith.constant 0 : i32
    %c0_i32_1 = arith.constant 0 : i32
    return %c0_i32, %c0_i32_0 : i32, i32
  }
  func.func @transform_4(%arg0: i32, %arg1: i32) -> (i32, i32, i32) {
    %c0_i32 = arith.constant 0 : i32
    %c0_i32_0 = arith.constant 0 : i32
    return %arg1, %arg0, %c0_i32 : i32, i32, i32
  }
}

module attributes {stable_mosaic.version = 11 : i64} {
  func.func @_emb_rmsnorm_onehot_kernel(%arg0: i32, %arg1: i32, %arg2: memref<1x1x8x1xi32, #tpu.memory_space<vmem>>, %arg3: memref<64x32xf32, #tpu.memory_space<vmem>>, %arg4: memref<8x32xf32, #tpu.memory_space<vmem>>, %arg5: memref<1x32xf32, #tpu.memory_space<vmem>>, %arg6: memref<1x8x32xf32, #tpu.memory_space<vmem>>) attributes {dimension_semantics = [#tpu.dimension_semantics<parallel>, #tpu.dimension_semantics<parallel>], iteration_bounds = array<i64: 1, 2>, scalar_prefetch = 0 : i64, scratch_operands = 0 : i64, tpu.core_type = #tpu.core_type<tc>, window_params = [{transform_indices = @transform_0, window_bounds = array<i64: 1, 1, 8, 1>}, {pipeline_mode = #tpu.pipeline_mode<synchronous>, transform_indices = @transform_1, window_bounds = array<i64: 64, 32>}, {transform_indices = @transform_2, window_bounds = array<i64: 8, 32>}, {pipeline_mode = #tpu.pipeline_mode<synchronous>, transform_indices = @transform_3, window_bounds = array<i64: 1, 32>}, {transform_indices = @transform_4, window_bounds = array<i64: 1, 8, 32>}]} {
    %c0 = arith.constant 0 : index
    %c0_0 = arith.constant 0 : index
    %c0_1 = arith.constant 0 : index
    %c0_2 = arith.constant 0 : index
    %0 = vector.load %arg2[%c0, %c0_0, %c0_1, %c0_2] : memref<1x1x8x1xi32, #tpu.memory_space<vmem>>, vector<1x1x8x1xi32>
    %1 = vector.shape_cast %0 : vector<1x1x8x1xi32> to vector<8x1xi32>
    %2 = tpu.iota {dimensions = array<i32: 1>} : vector<8x64xi32>
    %3 = vector.broadcast %1 : vector<8x1xi32> to vector<8x64xi32>
    %4 = arith.cmpi eq, %2, %3 : vector<8x64xi32>
    %5 = arith.extui %4 : vector<8x64xi1> to vector<8x64xi32>
    %6 = arith.sitofp %5 : vector<8x64xi32> to vector<8x64xf32>
    %c0_3 = arith.constant 0 : index
    %c0_4 = arith.constant 0 : index
    %7 = vector.load %arg3[%c0_3, %c0_4] : memref<64x32xf32, #tpu.memory_space<vmem>>, vector<64x32xf32>
    %cst = arith.constant dense<0.000000e+00> : vector<8x32xf32>
    %8 = tpu.matmul %6, %7, %cst {dimension_numbers = #tpu.dot_dimension_numbers<[1], [0], [0], [1], [0, 0, 1, 1], [], []>} : vector<8x64xf32>, vector<64x32xf32>, vector<8x32xf32> -> vector<8x32xf32>
    %c0_5 = arith.constant 0 : index
    %c0_6 = arith.constant 0 : index
    %9 = vector.load %arg4[%c0_5, %c0_6] : memref<8x32xf32, #tpu.memory_space<vmem>>, vector<8x32xf32>
    %10 = arith.addf %8, %9 : vector<8x32xf32>
    %11 = arith.mulf %10, %10 : vector<8x32xf32>
    %cst_7 = arith.constant dense<0.000000e+00> : vector<8xf32>
    %12 = vector.multi_reduction <add>, %11, %cst_7 [1] : vector<8x32xf32> to vector<8xf32>
    %13 = vector.shape_cast %12 : vector<8xf32> to vector<8x1xf32>
    %cst_8 = arith.constant 3.200000e+01 : f32
    %14 = vector.broadcast %cst_8 : f32 to vector<8x1xf32>
    %15 = arith.divf %13, %14 : vector<8x1xf32>
    %cst_9 = arith.constant 9.99999993E-9 : f32
    %16 = vector.broadcast %cst_9 : f32 to vector<8x1xf32>
    %17 = arith.addf %15, %16 : vector<8x1xf32>
    %18 = math.rsqrt %17 : vector<8x1xf32>
    %c0_10 = arith.constant 0 : index
    %c0_11 = arith.constant 0 : index
    %19 = vector.load %arg5[%c0_10, %c0_11] : memref<1x32xf32, #tpu.memory_space<vmem>>, vector<1x32xf32>
    %20 = vector.broadcast %18 : vector<8x1xf32> to vector<8x32xf32>
    %21 = arith.mulf %10, %20 : vector<8x32xf32>
    %22 = vector.broadcast %19 : vector<1x32xf32> to vector<8x32xf32>
    %23 = arith.mulf %22, %21 : vector<8x32xf32>
    %c0_12 = arith.constant 0 : index
    %c0_13 = arith.constant 0 : index
    %c0_14 = arith.constant 0 : index
    %24 = vector.load %arg6[%c0_12, %c0_13, %c0_14] : memref<1x8x32xf32, #tpu.memory_space<vmem>>, vector<1x8x32xf32>
    %25 = vector.shape_cast %24 : vector<1x8x32xf32> to vector<8x32xf32>
    %26 = vector.shape_cast %23 : vector<8x32xf32> to vector<1x8x32xf32>
    tpu.vector_store %arg6[%c0_12, %c0_13, %c0_14], %26 {strides = array<i32>} : memref<1x8x32xf32, #tpu.memory_space<vmem>>, vector<1x8x32xf32>,
    return
  }
  func.func @transform_0(%arg0: i32, %arg1: i32) -> (i32, i32, i32, i32) {
    %c0_i32 = arith.constant 0 : i32
    %c0_i32_0 = arith.constant 0 : i32
    %c0_i32_1 = arith.constant 0 : i32
    return %arg1, %arg0, %c0_i32, %c0_i32_0 : i32, i32, i32, i32
  }
  func.func @transform_1(%arg0: i32, %arg1: i32) -> (i32, i32) {
    %c0_i32 = arith.constant 0 : i32
    %c0_i32_0 = arith.constant 0 : i32
    %c0_i32_1 = arith.constant 0 : i32
    return %c0_i32, %c0_i32_0 : i32, i32
  }
  func.func @transform_2(%arg0: i32, %arg1: i32) -> (i32, i32) {
    %c0_i32 = arith.constant 0 : i32
    %c0_i32_0 = arith.constant 0 : i32
    return %arg0, %c0_i32 : i32, i32
  }
  func.func @transform_3(%arg0: i32, %arg1: i32) -> (i32, i32) {
    %c0_i32 = arith.constant 0 : i32
    %c0_i32_0 = arith.constant 0 : i32
    %c0_i32_1 = arith.constant 0 : i32
    return %c0_i32, %c0_i32_0 : i32, i32
  }
  func.func @transform_4(%arg0: i32, %arg1: i32) -> (i32, i32, i32) {
    %c0_i32 = arith.constant 0 : i32
    %c0_i32_0 = arith.constant 0 : i32
    return %arg1, %arg0, %c0_i32 : i32, i32, i32
  }
}

</mosaic_0001>

<bundles_post_ra>
// kernel: tpu_custom_call.1
= control target key start
LH: loop header
LB: loop body
LE: loop exit
PB: predicated region body
PF: predicated region fallthrough
CT: control target
= control target key end

     0   :  { %9 = vsyncpa [#allocation3], 0  ;;  %s789_s0 = inlined_call_operand.vmem [shape: s32[2,1,8,1], index: 0, kind: input, shape index: {}]   ;;  %s790_s1 = inlined_call_operand.vmem [shape: f32[64,32], index: 1, kind: input, shape index: {}]   ;;  %s791_s2 = inlined_call_operand.vmem [shape: f32[8,32], index: 2, kind: input, shape index: {}]   ;;  %s792_s3 = inlined_call_operand.vmem [shape: f32[1,32], index: 3, kind: input, shape index: {}]   ;;  %s793_s4 = inlined_call_operand.hbm [shape: f32[2,8,32], index: 4, kind: output, shape index: {}]  }
   0x1   :  { %11 = vsyncpa [#allocation3 + $0x1], 0  ;;  %s658_s15 = smov 0   ;;  %s660_s16 = smov 0  }
   0x2   :  { %s662_s17 = smov 0   ;;  %s664_s18 = smov 0  }
   0x3   :  { %s666_s19 = smov 0   ;;  %s668_s20 = smov 0  }
   0x4 LB: > { %s447_s21 = sadd.s32 4294967295, %s627_s20   ;;  %s448_s22 = sadd.s32 4294967294, %s627_s20   ;;  %s627_s20 = sphi %s668_s20, %s17_s20   ;;  %s623_s19 = sphi %s666_s19, %s800_s19   ;;  %s619_s18 = sphi %s664_s18, %s799_s18   ;;  %s615_s17 = sphi %s662_s17, %s798_s17   ;;  %s611_s16 = sphi %s660_s16, %s797_s16   ;;  %s607_s15 = sphi %s658_s15, %s796_s15  }
   0x5   : > { %s26_s23 = sadd.s32 1, %s623_s19  ;;  %s134_s24 = sadd.s32 1, %s615_s17 }
   0x6   : > { %p27_p0 = scmp.ge.s32.totalorder %s26_s23, 2  ;;  %p144_p1 = scmp.ne.s32.totalorder %s615_s17, %s611_s16 }
   0x7   : > { %p145_p2 = scmp.eq.s32.totalorder %s447_s21, 1  ;;  %p150_p3 = scmp.ne.s32.totalorder %s611_s16, %s607_s15 }
   0x8   : > { %s802_s23 = smov (%p27_p0, %s26_s23), 0  ;;  %p151_p5 = scmp.eq.s32.totalorder %s448_s22, 1 }
   0x9   : > { %p698_p4 = por %p145_p2, %p144_p1  ;;  %s129_s26 = ssub.s32 %s623_s19, %s802_s23 }
   0xa   : > { %p452_p6 = scmp.ge.s32.totalorder %s627_s20, 1  ;;  %p132_p7 = scmp.eq.s32.totalorder %s129_s26, 0 }
   0xb   : > { %p705_p8 = por %p151_p5, %p150_p3  ;;  %p192_p9 = scmp.lt.s32.totalorder %s627_s20, 3 }
   0xc   : > { %s711_s28 = scalar_select %p132_p7, %s615_s17, %s134_s24  }
   0xd   : > { %p193_p10 = pnand %p452_p6, %p192_p9 }
   0xe   : > { %p224_p11 = scmp.lt.s32.totalorder (!%p193_p10), %s619_s18, 1  ;;  %s459_s14 = sshll.u32 (!%p193_p10), %s619_s18, 7 }
   0xf   : > { %196 = sbr.rel (%p193_p10) target bundleno = 522 (0x20a), region = 36  ;;  %s359_s29 = scalar_lea.hbm (!%p193_p10), %s793_s4, %s459_s14 }
  0x10   : > { %s632_s6 = smov (!%p193_p10), [#allocation2]  }
  0x14   : > { %v251_v0 = vld [vmem:[%s790_s1 + $0x38] sm:$0xff]  ;;  %v629_v1 = vmov 0   ;;  %v630_v2 = vmov 0.0   ;;  %v250_v3 = vld [vmem:[%s790_s1 + $0x30] sm:$0xff]  ;;  %s225_s7 = scalar_select %p224_p11, %s619_s18, 1  ;;  %v249_v4 = vld [vmem:[%s790_s1 + $0x28] sm:$0xff]  ;;  %v236_v11 = vlaneseq }
  0x15   : > { %548 = vset.pattern.permute.xlu0 %v629_v1  ;;  %471 = vmatprep.subr.mxu0 %v630_v2  ;;  %vm631_vm0 = vmmov 0   ;;  %v248_v5 = vld [vmem:[%s790_s1 + $0x20] sm:$0xff]  ;;  %v247_v7 = vld [vmem:[%s790_s1 + $0x18] sm:$0xff]  ;;  %v246_v8 = vld [vmem:[%s790_s1 + $0x10] sm:$0xff]  ;;  %vm253_vm1 = vcmask 523264   ;;  %vm328_vm3 = vcmask 261120  }
  0x16   : > { %472 = vmatpush3.msra.mxu0 %v251_v0  ;;  %s454_s10 = sshll.u32 %s225_s7, 3  ;;  %487 = vmatprep.mubr.msk.f32.mxu0 %vm631_vm0, %v630_v2  ;;  %v245_v9 = vld [vmem:[%s790_s1 + $0x8] sm:$0xff]  ;;  %v244_v10 = vld [vmem:[%s790_s1] sm:$0xff]  ;;  %v237_v12 = vand.u32 127, %v236_v11  ;;  %s555_s7 = sshll.u32 %s632_s6, 4  ;;  %s556_s7 = int_to_ptr.vmem [resolvable:$false] %s555_s7 }
  0x17   : > { %473 = vmatprep.subr.mxu0 %v630_v2  ;;  %s230_s13 = scalar_lea.vmem %s789_s0, %s454_s10  ;;  %v252_v15 = vld [vmem:[%s791_s2] sm:$0xff]  ;;  %s221_s10 = sand.u32 1, %s611_s16  }
  0x18   : > { %474 = vmatpush3.msra.mxu0 %v250_v3  ;;  %v235_v6 = vld [vmem:[%s230_s13] sm:$0xff]  ;;  %s453_s11 = sshll.u32 %s221_s10, 3  ;;  %s347_s30 = scalar_lea.sflag [#allocation3], %s221_s10 }
  0x19   : > { %475 = vmatprep.subr.mxu0 %v630_v2  ;;  %239 = vperm.xlu0 %548, %v235_v6   ;;  %v457_v25 = vld [vmem:[%s792_s3] ss:$0 sm:$0xff]  ;;  %s223_s21 = scalar_lea.vmem [#allocation2], %s453_s11  ;;  %s557_s18 = scalar_lea.vmem %s556_s7, 256 }
  0x1a   : > { %476 = vmatpush3.msra.mxu0 %v249_v4  ;;  %s361_s22 = sshll.u32 %s223_s21, 4  ;;  %s362_s22 = int_to_ptr.vmem [resolvable:$true] %s361_s22 }
  0x1b   : > { %477 = vmatprep.subr.mxu0 %v630_v2  ;;  %s551_s5 = scalar_lea.vmem %s362_s22, 128  ;;  %p558_p1 = scmp.lt.s32.totalorder %s362_s22, %s556_s7 }
  0x1c   : > { %478 = vmatpush3.msra.mxu0 %v248_v5  ;;  %p552_p12 = scmp.ne.s32.totalorder %s362_s22, %s551_s5  ;;  %p559_p2 = scmp.lt.s32.totalorder %s557_s18, %s551_s5 }
  0x1d   : > { %479 = vmatprep.subr.mxu0 %v630_v2 }
  0x1e   : > { %480 = vmatpush3.msra.mxu0 %v247_v7  ;;  %p553_p13 = pnand %p552_p12, %p698_p4  ;;  %p560_p3 = por %p559_p2, %p558_p1 }
  0x1f   : > { %481 = vmatprep.subr.mxu0 %v630_v2 }
  0x20   : > { %482 = vmatpush3.msra.mxu0 %v246_v8  ;;  %p554_p0 = pneg %p553_p13 }
  0x21   : > { %483 = vmatprep.subr.mxu0 %v630_v2 }
  0x22   : > { %484 = vmatpush3.msra.mxu0 %v245_v9  ;;  %p561_p5 = pnand %p560_p3, %p554_p0 }
  0x23   : > { %485 = vmatprep.subr.mxu0 %v630_v2 }
  0x24   : > { %486 = vmatpush3.msra.mxu0 %v244_v10 }
  0x94   : > { %v240_v13 = vpop.permute.xlu0 %239 }
  0x95   : > { %vm241_vm2 = vcmp.eq.s32.totalorder %v237_v12, %v240_v13 }
  0x96   : > { %v455_v14 = vsel %vm241_vm2, 1.0, %v630_v2 }
  0x97   : > { %488 = vmatmul.mubr.msk.f32.vlgmr.msra.gmra.mxu0 %vm253_vm1, %v455_v14 }
 0x157   : > { %v323_v16 = vpop.f32.mrf.mxu0 }
 0x158   : > { %v324_v17 = vadd.f32 %v323_v16, %v252_v15 }
 0x159   : > { %v489_v18 = vpop.f32.mrf.mxu0 }
 0x15a   : > { %v327_v19 = vmul.f32 %v324_v17, %v324_v17 }
 0x15c   : > { %v329_v20 = vsel %vm328_vm3, %v327_v19, 0.0 }
 0x15d   : > { %330 = vadd.xlane.f32.xlu0 %v329_v20 }
 0x1e6   : > { %v331_v21 = vpop.xlane.xlu0 %330 }
 0x1e7   : > { %v333_v22 = vmul.f32 0.03125, %v331_v21 }
 0x1e9   : > { %v334_v23 = vadd.f32 1e-08, %v333_v22 }
 0x1eb   : > { %549 = vrsqrt.f32 %v334_v23 }
 0x1f8   : > { %v550_v24 = vpop.eup %549 }
 0x1f9   : > { %v337_v26 = vmul.f32 %v550_v24, %v324_v17 }
 0x1fb   : > { %v344_v27 = vmul.f32 %v457_v25, %v337_v26 }
 0x1fd   : > { %345 = vst.msk [vmem:[%s223_s21] sm:$0xff] %vm328_vm3, %v344_v27 }
 0x1fe   : > { %564 = shalt.err (!%p561_p5)
}
 0x1ff   : > { %s565_s8 = scalar_lea.hbm %s359_s29, 128  ;;  %s569_s11 = scalar_lea.hbm %s793_s4, 256 }
 0x200   : > { %p566_p6 = scmp.ne.s32.totalorder %s359_s29, %s565_s8  ;;  %p570_p10 = scmp.lt.s32.totalorder %s359_s29, %s793_s4 }
 0x201   : > { %p571_p11 = scmp.lt.s32.totalorder %s569_s11, %s565_s8 }
 0x202   : > { %p567_p7 = pnand %p566_p6, %p698_p4 }
 0x203   : > { %p572_p12 = por %p571_p11, %p570_p10 }
 0x204   : > { %p568_p9 = pneg %p567_p7 }
 0x206   : > { %p573_p13 = pnand %p572_p12, %p568_p9 }
 0x208   : > { %576 = shalt.err (!%p573_p13)
}
 0x209   : > { %490 = dma.vmem_to_hbm [thread:$0]  (%p698_p4), %s362_s22, 128, %s359_s29, %s347_s30  }
 0x20a PF: > { %p496_p0 = scmp.ge.s32.totalorder %s627_s20, 2  ;;  %s373_s14 = sand.u32 1, %s607_s15  }
 0x20b   : > { %s374_s21 = scalar_lea.sflag [#allocation3], %s373_s14 }
 0x20c   : > { %p493_p1 = pnand %p496_p0, %p705_p8 }
 0x20e   : > { %p494_p2 = pneg %p493_p1 }
 0x210   : > { %602 = dma.done.wait (%p494_p2), %s374_s21, 128  }
 0x211   : > { %604 = vsyncadd (%p494_p2), %s374_s21, 4294967168  ;;  %s17_s20 = sadd.s32 1, %s627_s20   ;;  %s796_s15 = smov %s611_s16 }
 0x212   : > { %p14_p3 = scmp.ge.s32.totalorder %s17_s20, 4   ;;  %s797_s16 = smov %s615_s17 }
 0x213   : > { %s798_s17 = smov %s711_s28  ;;  %s799_s18 = smov %s623_s19 }
 0x214   : > { %s800_s19 = smov %s802_s23  ;;  %16 = sbr.rel (!%p14_p3) target bundleno = 4 (0x4), region = 74 }
 0x219   :  { %379 = vsyncpa [#allocation3], 1 }
 0x21a   :  { %381 = vsyncpa [#allocation3 + $0x1], 1 }

// kernel: tpu_custom_call.1
= control target key start
LH: loop header
LB: loop body
LE: loop exit
PB: predicated region body
PF: predicated region fallthrough
CT: control target
= control target key end

     0   :  { %9 = vsyncpa [#allocation3], 0  ;;  %s789_s0 = inlined_call_operand.vmem [shape: s32[2,1,8,1], index: 0, kind: input, shape index: {}]   ;;  %s790_s1 = inlined_call_operand.vmem [shape: f32[64,32], index: 1, kind: input, shape index: {}]   ;;  %s791_s2 = inlined_call_operand.vmem [shape: f32[8,32], index: 2, kind: input, shape index: {}]   ;;  %s792_s3 = inlined_call_operand.vmem [shape: f32[1,32], index: 3, kind: input, shape index: {}]   ;;  %s793_s4 = inlined_call_operand.hbm [shape: f32[2,8,32], index: 4, kind: output, shape index: {}]  }
   0x1   :  { %11 = vsyncpa [#allocation3 + $0x1], 0  ;;  %s658_s15 = smov 0   ;;  %s660_s16 = smov 0  }
   0x2   :  { %s662_s17 = smov 0   ;;  %s664_s18 = smov 0  }
   0x3   :  { %s666_s19 = smov 0   ;;  %s668_s20 = smov 0  }
   0x4 LB: > { %s447_s21 = sadd.s32 4294967295, %s627_s20   ;;  %s448_s22 = sadd.s32 4294967294, %s627_s20   ;;  %s627_s20 = sphi %s668_s20, %s17_s20   ;;  %s623_s19 = sphi %s666_s19, %s800_s19   ;;  %s619_s18 = sphi %s664_s18, %s799_s18   ;;  %s615_s17 = sphi %s662_s17, %s798_s17   ;;  %s611_s16 = sphi %s660_s16, %s797_s16   ;;  %s607_s15 = sphi %s658_s15, %s796_s15  }
   0x5   : > { %s26_s23 = sadd.s32 1, %s623_s19  ;;  %s134_s24 = sadd.s32 1, %s615_s17 }
   0x6   : > { %p27_p0 = scmp.ge.s32.totalorder %s26_s23, 2  ;;  %p144_p1 = scmp.ne.s32.totalorder %s615_s17, %s611_s16 }
   0x7   : > { %p145_p2 = scmp.eq.s32.totalorder %s447_s21, 1  ;;  %p150_p3 = scmp.ne.s32.totalorder %s611_s16, %s607_s15 }
   0x8   : > { %s802_s23 = smov (%p27_p0, %s26_s23), 0  ;;  %p151_p5 = scmp.eq.s32.totalorder %s448_s22, 1 }
   0x9   : > { %p698_p4 = por %p145_p2, %p144_p1  ;;  %s129_s26 = ssub.s32 %s623_s19, %s802_s23 }
   0xa   : > { %p452_p6 = scmp.ge.s32.totalorder %s627_s20, 1  ;;  %p132_p7 = scmp.eq.s32.totalorder %s129_s26, 0 }
   0xb   : > { %p705_p8 = por %p151_p5, %p150_p3  ;;  %p192_p9 = scmp.lt.s32.totalorder %s627_s20, 3 }
   0xc   : > { %s711_s28 = scalar_select %p132_p7, %s615_s17, %s134_s24  }
   0xd   : > { %p193_p10 = pnand %p452_p6, %p192_p9 }
   0xe   : > { %p224_p11 = scmp.lt.s32.totalorder (!%p193_p10), %s619_s18, 1  ;;  %s459_s14 = sshll.u32 (!%p193_p10), %s619_s18, 7 }
   0xf   : > { %196 = sbr.rel (%p193_p10) target bundleno = 522 (0x20a), region = 36  ;;  %s359_s29 = scalar_lea.hbm (!%p193_p10), %s793_s4, %s459_s14 }
  0x10   : > { %s632_s6 = smov (!%p193_p10), [#allocation2]  }
  0x14   : > { %v251_v0 = vld [vmem:[%s790_s1 + $0x38] sm:$0xff]  ;;  %v629_v1 = vmov 0   ;;  %v630_v2 = vmov 0.0   ;;  %v250_v3 = vld [vmem:[%s790_s1 + $0x30] sm:$0xff]  ;;  %s225_s7 = scalar_select %p224_p11, %s619_s18, 1  ;;  %v249_v4 = vld [vmem:[%s790_s1 + $0x28] sm:$0xff]  ;;  %v236_v11 = vlaneseq }
  0x15   : > { %548 = vset.pattern.permute.xlu0 %v629_v1  ;;  %471 = vmatprep.subr.mxu0 %v630_v2  ;;  %vm631_vm0 = vmmov 0   ;;  %v248_v5 = vld [vmem:[%s790_s1 + $0x20] sm:$0xff]  ;;  %v247_v7 = vld [vmem:[%s790_s1 + $0x18] sm:$0xff]  ;;  %v246_v8 = vld [vmem:[%s790_s1 + $0x10] sm:$0xff]  ;;  %vm253_vm1 = vcmask 523264   ;;  %vm328_vm3 = vcmask 261120  }
  0x16   : > { %472 = vmatpush3.msra.mxu0 %v251_v0  ;;  %s454_s10 = sshll.u32 %s225_s7, 3  ;;  %487 = vmatprep.mubr.msk.f32.mxu0 %vm631_vm0, %v630_v2  ;;  %v245_v9 = vld [vmem:[%s790_s1 + $0x8] sm:$0xff]  ;;  %v244_v10 = vld [vmem:[%s790_s1] sm:$0xff]  ;;  %v237_v12 = vand.u32 127, %v236_v11  ;;  %s555_s7 = sshll.u32 %s632_s6, 4  ;;  %s556_s7 = int_to_ptr.vmem [resolvable:$false] %s555_s7 }
  0x17   : > { %473 = vmatprep.subr.mxu0 %v630_v2  ;;  %s230_s13 = scalar_lea.vmem %s789_s0, %s454_s10  ;;  %v252_v15 = vld [vmem:[%s791_s2] sm:$0xff]  ;;  %s221_s10 = sand.u32 1, %s611_s16  }
  0x18   : > { %474 = vmatpush3.msra.mxu0 %v250_v3  ;;  %v235_v6 = vld [vmem:[%s230_s13] sm:$0xff]  ;;  %s453_s11 = sshll.u32 %s221_s10, 3  ;;  %s347_s30 = scalar_lea.sflag [#allocation3], %s221_s10 }
  0x19   : > { %475 = vmatprep.subr.mxu0 %v630_v2  ;;  %239 = vperm.xlu0 %548, %v235_v6   ;;  %v457_v25 = vld [vmem:[%s792_s3] ss:$0 sm:$0xff]  ;;  %s223_s21 = scalar_lea.vmem [#allocation2], %s453_s11  ;;  %s557_s18 = scalar_lea.vmem %s556_s7, 256 }
  0x1a   : > { %476 = vmatpush3.msra.mxu0 %v249_v4  ;;  %s361_s22 = sshll.u32 %s223_s21, 4  ;;  %s362_s22 = int_to_ptr.vmem [resolvable:$true] %s361_s22 }
  0x1b   : > { %477 = vmatprep.subr.mxu0 %v630_v2  ;;  %s551_s5 = scalar_lea.vmem %s362_s22, 128  ;;  %p558_p1 = scmp.lt.s32.totalorder %s362_s22, %s556_s7 }
  0x1c   : > { %478 = vmatpush3.msra.mxu0 %v248_v5  ;;  %p552_p12 = scmp.ne.s32.totalorder %s362_s22, %s551_s5  ;;  %p559_p2 = scmp.lt.s32.totalorder %s557_s18, %s551_s5 }
  0x1d   : > { %479 = vmatprep.subr.mxu0 %v630_v2 }
  0x1e   : > { %480 = vmatpush3.msra.mxu0 %v247_v7  ;;  %p553_p13 = pnand %p552_p12, %p698_p4  ;;  %p560_p3 = por %p559_p2, %p558_p1 }
  0x1f   : > { %481 = vmatprep.subr.mxu0 %v630_v2 }
  0x20   : > { %482 = vmatpush3.msra.mxu0 %v246_v8  ;;  %p554_p0 = pneg %p553_p13 }
  0x21   : > { %483 = vmatprep.subr.mxu0 %v630_v2 }
  0x22   : > { %484 = vmatpush3.msra.mxu0 %v245_v9  ;;  %p561_p5 = pnand %p560_p3, %p554_p0 }
  0x23   : > { %485 = vmatprep.subr.mxu0 %v630_v2 }
  0x24   : > { %486 = vmatpush3.msra.mxu0 %v244_v10 }
  0x94   : > { %v240_v13 = vpop.permute.xlu0 %239 }
  0x95   : > { %vm241_vm2 = vcmp.eq.s32.totalorder %v237_v12, %v240_v13 }
  0x96   : > { %v455_v14 = vsel %vm241_vm2, 1.0, %v630_v2 }
  0x97   : > { %488 = vmatmul.mubr.msk.f32.vlgmr.msra.gmra.mxu0 %vm253_vm1, %v455_v14 }
 0x157   : > { %v323_v16 = vpop.f32.mrf.mxu0 }
 0x158   : > { %v324_v17 = vadd.f32 %v323_v16, %v252_v15 }
 0x159   : > { %v489_v18 = vpop.f32.mrf.mxu0 }
 0x15a   : > { %v327_v19 = vmul.f32 %v324_v17, %v324_v17 }
 0x15c   : > { %v329_v20 = vsel %vm328_vm3, %v327_v19, 0.0 }
 0x15d   : > { %330 = vadd.xlane.f32.xlu0 %v329_v20 }
 0x1e6   : > { %v331_v21 = vpop.xlane.xlu0 %330 }
 0x1e7   : > { %v333_v22 = vmul.f32 0.03125, %v331_v21 }
 0x1e9   : > { %v334_v23 = vadd.f32 1e-08, %v333_v22 }
 0x1eb   : > { %549 = vrsqrt.f32 %v334_v23 }
 0x1f8   : > { %v550_v24 = vpop.eup %549 }
 0x1f9   : > { %v337_v26 = vmul.f32 %v550_v24, %v324_v17 }
 0x1fb   : > { %v344_v27 = vmul.f32 %v457_v25, %v337_v26 }
 0x1fd   : > { %345 = vst.msk [vmem:[%s223_s21] sm:$0xff] %vm328_vm3, %v344_v27 }
 0x1fe   : > { %564 = shalt.err (!%p561_p5)
}
 0x1ff   : > { %s565_s8 = scalar_lea.hbm %s359_s29, 128  ;;  %s569_s11 = scalar_lea.hbm %s793_s4, 256 }
 0x200   : > { %p566_p6 = scmp.ne.s32.totalorder %s359_s29, %s565_s8  ;;  %p570_p10 = scmp.lt.s32.totalorder %s359_s29, %s793_s4 }
 0x201   : > { %p571_p11 = scmp.lt.s32.totalorder %s569_s11, %s565_s8 }
 0x202   : > { %p567_p7 = pnand %p566_p6, %p698_p4 }
 0x203   : > { %p572_p12 = por %p571_p11, %p570_p10 }
 0x204   : > { %p568_p9 = pneg %p567_p7 }
 0x206   : > { %p573_p13 = pnand %p572_p12, %p568_p9 }
 0x208   : > { %576 = shalt.err (!%p573_p13)
}
 0x209   : > { %490 = dma.vmem_to_hbm [thread:$0]  (%p698_p4), %s362_s22, 128, %s359_s29, %s347_s30  }
 0x20a PF: > { %p496_p0 = scmp.ge.s32.totalorder %s627_s20, 2  ;;  %s373_s14 = sand.u32 1, %s607_s15  }
 0x20b   : > { %s374_s21 = scalar_lea.sflag [#allocation3], %s373_s14 }
 0x20c   : > { %p493_p1 = pnand %p496_p0, %p705_p8 }
 0x20e   : > { %p494_p2 = pneg %p493_p1 }
 0x210   : > { %602 = dma.done.wait (%p494_p2), %s374_s21, 128  }
 0x211   : > { %604 = vsyncadd (%p494_p2), %s374_s21, 4294967168  ;;  %s17_s20 = sadd.s32 1, %s627_s20   ;;  %s796_s15 = smov %s611_s16 }
 0x212   : > { %p14_p3 = scmp.ge.s32.totalorder %s17_s20, 4   ;;  %s797_s16 = smov %s615_s17 }
 0x213   : > { %s798_s17 = smov %s711_s28  ;;  %s799_s18 = smov %s623_s19 }
 0x214   : > { %s800_s19 = smov %s802_s23  ;;  %16 = sbr.rel (!%p14_p3) target bundleno = 4 (0x4), region = 74 }
 0x219   :  { %379 = vsyncpa [#allocation3], 1 }
 0x21a   :  { %381 = vsyncpa [#allocation3 + $0x1], 1 }

</bundles_post_ra>
